<compile_context>
chip_gen: v7x
topology: tpu7x:2x2x1
jax: 0.10.0
libtpu: 0.0.40
codegen_flags: <defaults>
</compile_context>

<pallas_src>
import functools

import jax
import jax.numpy as jnp
from jax.experimental import pallas as pl
from jax.experimental.pallas import tpu as pltpu


# ----------------------------- kernel ---------------------------------------
def _decoder_kernel(x_ref, w1_ref, b1_ref, w2_ref, b2_ref, o_ref):
    # x_ref:  (tile_r, d_in)   d_in = node_dim * PACK   (PACK original rows per packed row)
    # w1_ref: (d_in, d_in)     block-diagonal: PACK copies of W1 (resident in VMEM)
    # b1_ref: (1, d_in)        b1 tiled PACK times
    # w2_ref: (d_in, d_out)    block-diagonal: PACK copies of W2, d_out = out_dim * PACK
    # b2_ref: (1, d_out)       b2 tiled PACK times
    # o_ref:  (tile_r, d_out)  lane-dense packed output
    x = x_ref[...]
    h = jnp.dot(x, w1_ref[...], preferred_element_type=jnp.float32) + b1_ref[...]
    h = h * jax.nn.sigmoid(h)            # SiLU: sigmoid -> EUP slot, mul -> VPU
    y = jnp.dot(h, w2_ref[...], preferred_element_type=jnp.float32) + b2_ref[...]
    o_ref[...] = y.astype(o_ref.dtype)


# ----------------------------- parameter packing ----------------------------
def choose_pack(node_dim, out_dim):
    """Rows packed per 128-lane row; capped so the block-diag contraction dim stays modest."""
    pack = 128 // out_dim if (0 < out_dim <= 128 and 128 % out_dim == 0) else 1
    while pack > 1 and node_dim * pack > 1024:
        pack //= 2
    return max(pack, 1)


def pack_decoder_params(w1, b1, w2, b2, pack):
    """Precompute block-diagonal weights / tiled biases ONCE per parameter set."""
    node_dim = w1.shape[0]
    out_dim = w2.shape[1]
    eye = jnp.eye(pack, dtype=w1.dtype)
    w1_bd = jnp.kron(eye, w1)                                   # (d_in, d_in)
    w2_bd = jnp.kron(eye.astype(w2.dtype), w2)                  # (d_in, d_out)
    b1_p = jnp.tile(b1.reshape(1, node_dim), (1, pack))         # (1, d_in)
    b2_p = jnp.tile(b2.reshape(1, out_dim), (1, pack))          # (1, d_out)
    return w1_bd, b1_p, w2_bd, b2_p


# ----------------------------- forward --------------------------------------
def decoder_apply_packed(h_node, w1_bd, b1_p, w2_bd, b2_p, *, pack, tile_m=16384):
    """Fused 2-layer MLP with pre-packed params: h_node [N, node_dim] -> [N, out_dim]."""
    N, node_dim = h_node.shape
    d_in = node_dim * pack
    d_out = b2_p.shape[1]
    out_dim = d_out // pack
    orig_dtype = h_node.dtype
    itemsize = jnp.dtype(orig_dtype).itemsize

    # --- pad only to a multiple of pack (<= pack-1 rows; no-op when aligned) ---
    n_pad = ((N + pack - 1) // pack) * pack
    x = h_node if n_pad == N else jnp.pad(h_node, ((0, n_pad - N), (0, 0)))
    x_packed = x.reshape(n_pad // pack, d_in)        # free row-major reshape
    packed_rows = n_pad // pack

    # --- tile sizing (packed rows per grid step, multiple of 8 sublanes) -------
    row_q = 8
    tile_r = max(row_q, ((tile_m // pack) // row_q) * row_q)
    # VMEM cap: double-buffered x+out tiles <= ~24 MiB (safe under v7x's 64 MiB/TC)
    max_tile_r = (24 * 1024 * 1024) // (2 * (d_in + d_out) * 4)
    max_tile_r = max(row_q, (max_tile_r // row_q) * row_q)
    tile_r = min(tile_r, max_tile_r)
    # never use a block bigger than the (rounded-up) problem
    tile_r = min(tile_r, ((packed_rows + row_q - 1) // row_q) * row_q)
    # ensure >= 2 grid steps when there is enough work (keeps both v7x TCs busy)
    if packed_rows > row_q:
        half = ((pl.cdiv(packed_rows, 2) + row_q - 1) // row_q) * row_q
        tile_r = min(tile_r, max(row_q, half))

    grid_m = pl.cdiv(packed_rows, tile_r)
    # prefer an even number of grid steps for the 2-TC split on v7x
    if grid_m > 2 and grid_m % 2 == 1:
        tile_r2 = max(row_q, ((pl.cdiv(packed_rows, grid_m + 1) + row_q - 1) // row_q) * row_q)
        if pl.cdiv(packed_rows, tile_r2) % 2 == 0:
            tile_r = tile_r2
            grid_m = pl.cdiv(packed_rows, tile_r)

    # --- VMEM limit: actual need (2x-buffered tiles + resident weights) + slack ---
    tiles_bytes = 2 * tile_r * (d_in + d_out) * 4
    weight_bytes = 2 * (d_in * d_in + d_in * d_out + d_in + d_out) * 4
    vmem_limit = int(min(max(2 * (tiles_bytes + weight_bytes), 16 * 1024 * 1024),
                         48 * 1024 * 1024))

    cost = pl.CostEstimate(
        flops=2 * packed_rows * d_in * (d_in + d_out),
        transcendentals=packed_rows * d_in,
        bytes_accessed=(x_packed.size + w1_bd.size + w2_bd.size + b1_p.size + b2_p.size
                        + packed_rows * d_out) * itemsize,
    )

    out_packed = pl.pallas_call(
        _decoder_kernel,
        out_shape=jax.ShapeDtypeStruct((packed_rows, d_out), orig_dtype),
        grid_spec=pltpu.PrefetchScalarGridSpec(
            num_scalar_prefetch=0,
            grid=(grid_m,),
            in_specs=[
                pl.BlockSpec((tile_r, d_in), lambda i: (i, 0)),   # packed x tile (ragged-OK)
                pl.BlockSpec((d_in, d_in), lambda i: (0, 0)),     # W1 block-diag (resident)
                pl.BlockSpec((1, d_in), lambda i: (0, 0)),        # b1 (resident)
                pl.BlockSpec((d_in, d_out), lambda i: (0, 0)),    # W2 block-diag (resident)
                pl.BlockSpec((1, d_out), lambda i: (0, 0)),       # b2 (resident)
            ],
            out_specs=pl.BlockSpec((tile_r, d_out), lambda i: (i, 0)),
        ),
        compiler_params=pltpu.CompilerParams(
            dimension_semantics=("parallel",),      # shards grid across both TCs on v7x
            vmem_limit_bytes=vmem_limit,
        ),
        cost_estimate=cost,
    )(x_packed, w1_bd, b1_p, w2_bd, b2_p)

    out = out_packed.reshape(n_pad, out_dim)        # free row-major view back
    return out[:N] if n_pad != N else out


def decoder_forward(h_node, w1, b1, w2, b2, *, tile_m=16384):
    """Convenience one-shot wrapper (packs params on the fly)."""
    node_dim = w1.shape[0]
    out_dim = w2.shape[1]
    pack = choose_pack(node_dim, out_dim)
    packed = pack_decoder_params(w1, b1, w2, b2, pack)
    return decoder_apply_packed(h_node, *packed, pack=pack, tile_m=tile_m)


def decoder_reference(h_node, w1, b1, w2, b2):
    h = h_node.astype(jnp.float32) @ w1 + b1
    h = h * jax.nn.sigmoid(h)
    return (h @ w2 + b2).astype(h_node.dtype)


if __name__ == "__main__":
    # Small shapes consistent with the module. N is not a multiple of the tile so the
    # ragged-last-block path is exercised, and packed_rows > 8 so the grid has 2 steps.
    N, node_dim, out_dim = 1000, 32, 16

    key = jax.random.PRNGKey(0)
    k_x, k_w1, k_b1, k_w2, k_b2 = jax.random.split(key, 5)

    h_node = jax.random.normal(k_x, (N, node_dim), dtype=jnp.float32)
    # Linear layers stored as [in, out] weight + [out] bias.
    w1 = jax.random.normal(k_w1, (node_dim, node_dim), dtype=jnp.float32) * 0.1
    b1 = jax.random.normal(k_b1, (node_dim,), dtype=jnp.float32) * 0.01
    w2 = jax.random.normal(k_w2, (node_dim, out_dim), dtype=jnp.float32) * 0.1
    b2 = jax.random.normal(k_b2, (out_dim,), dtype=jnp.float32) * 0.01

    # Hoist weight packing out of the hot path: done once, eagerly.
    pack = choose_pack(node_dim, out_dim)
    packed_params = pack_decoder_params(w1, b1, w2, b2, pack)

    fwd = jax.jit(functools.partial(decoder_apply_packed, pack=pack))
    out = jax.block_until_ready(fwd(h_node, *packed_params))

    ref = decoder_reference(h_node, w1, b1, w2, b2)
    assert out.shape == (N, out_dim)
    assert jnp.allclose(out, ref, atol=2e-5, rtol=1e-5), "mismatch vs reference"

    print("KERNEL_OK")
</pallas_src>

<mosaic_0001>
module attributes {stable_mosaic.version = 11 : i64} {
  func.func @_decoder_kernel(%arg0: i32, %arg1: memref<64x256xf32, #tpu.memory_space<vmem>>, %arg2: memref<256x256xf32, #tpu.memory_space<vmem>>, %arg3: memref<1x256xf32, #tpu.memory_space<vmem>>, %arg4: memref<256x128xf32, #tpu.memory_space<vmem>>, %arg5: memref<1x128xf32, #tpu.memory_space<vmem>>, %arg6: memref<64x128xf32, #tpu.memory_space<vmem>>) attributes {dimension_semantics = [#tpu.dimension_semantics<parallel>], iteration_bounds = array<i64: 2>, scalar_prefetch = 0 : i64, scratch_operands = 0 : i64, tpu.core_type = #tpu.core_type<tc>, window_params = [{transform_indices = @transform_0, window_bounds = array<i64: 64, 256>}, {pipeline_mode = #tpu.pipeline_mode<synchronous>, transform_indices = @transform_1, window_bounds = array<i64: 256, 256>}, {pipeline_mode = #tpu.pipeline_mode<synchronous>, transform_indices = @transform_2, window_bounds = array<i64: 1, 256>}, {pipeline_mode = #tpu.pipeline_mode<synchronous>, transform_indices = @transform_3, window_bounds = array<i64: 256, 128>}, {pipeline_mode = #tpu.pipeline_mode<synchronous>, transform_indices = @transform_4, window_bounds = array<i64: 1, 128>}, {transform_indices = @transform_5, window_bounds = array<i64: 64, 128>}]} {
    %c0 = arith.constant 0 : index
    %c0_0 = arith.constant 0 : index
    %0 = vector.load %arg1[%c0, %c0_0] : memref<64x256xf32, #tpu.memory_space<vmem>>, vector<64x256xf32>
    %c0_1 = arith.constant 0 : index
    %c0_2 = arith.constant 0 : index
    %1 = vector.load %arg2[%c0_1, %c0_2] : memref<256x256xf32, #tpu.memory_space<vmem>>, vector<256x256xf32>
    %cst = arith.constant dense<0.000000e+00> : vector<64x256xf32>
    %2 = tpu.matmul %0, %1, %cst {dimension_numbers = #tpu.dot_dimension_numbers<[1], [0], [0], [1], [0, 0, 1, 1], [], []>} : vector<64x256xf32>, vector<256x256xf32>, vector<64x256xf32> -> vector<64x256xf32>
    %c0_3 = arith.constant 0 : index
    %c0_4 = arith.constant 0 : index
    %3 = vector.load %arg3[%c0_3, %c0_4] : memref<1x256xf32, #tpu.memory_space<vmem>>, vector<1x256xf32>
    %4 = vector.broadcast %3 : vector<1x256xf32> to vector<64x256xf32>
    %5 = arith.addf %2, %4 : vector<64x256xf32>
    %6 = arith.negf %5 : vector<64x256xf32>
    %7 = math.exp %6 : vector<64x256xf32>
    %cst_5 = arith.constant 1.000000e+00 : f32
    %8 = vector.broadcast %cst_5 : f32 to vector<64x256xf32>
    %9 = arith.addf %8, %7 : vector<64x256xf32>
    %10 = arith.divf %8, %9 : vector<64x256xf32>
    %11 = arith.mulf %5, %10 : vector<64x256xf32>
    %c0_6 = arith.constant 0 : index
    %c0_7 = arith.constant 0 : index
    %12 = vector.load %arg4[%c0_6, %c0_7] : memref<256x128xf32, #tpu.memory_space<vmem>>, vector<256x128xf32>
    %cst_8 = arith.constant dense<0.000000e+00> : vector<64x128xf32>
    %13 = tpu.matmul %11, %12, %cst_8 {dimension_numbers = #tpu.dot_dimension_numbers<[1], [0], [0], [1], [0, 0, 1, 1], [], []>} : vector<64x256xf32>, vector<256x128xf32>, vector<64x128xf32> -> vector<64x128xf32>
    %c0_9 = arith.constant 0 : index
    %c0_10 = arith.constant 0 : index
    %14 = vector.load %arg5[%c0_9, %c0_10] : memref<1x128xf32, #tpu.memory_space<vmem>>, vector<1x128xf32>
    %15 = vector.broadcast %14 : vector<1x128xf32> to vector<64x128xf32>
    %16 = arith.addf %13, %15 : vector<64x128xf32>
    %c0_11 = arith.constant 0 : index
    %c0_12 = arith.constant 0 : index
    %17 = vector.load %arg6[%c0_11, %c0_12] : memref<64x128xf32, #tpu.memory_space<vmem>>, vector<64x128xf32>
    tpu.vector_store %arg6[%c0_11, %c0_12], %16 {strides = array<i32>} : memref<64x128xf32, #tpu.memory_space<vmem>>, vector<64x128xf32>,
    return
  }
  func.func @transform_0(%arg0: i32) -> (i32, i32) {
    %c0_i32 = arith.constant 0 : i32
    %c0_i32_0 = arith.constant 0 : i32
    return %arg0, %c0_i32 : i32, i32
  }
  func.func @transform_1(%arg0: i32) -> (i32, i32) {
    %c0_i32 = arith.constant 0 : i32
    %c0_i32_0 = arith.constant 0 : i32
    %c0_i32_1 = arith.constant 0 : i32
    return %c0_i32, %c0_i32_0 : i32, i32
  }
  func.func @transform_2(%arg0: i32) -> (i32, i32) {
    %c0_i32 = arith.constant 0 : i32
    %c0_i32_0 = arith.constant 0 : i32
    %c0_i32_1 = arith.constant 0 : i32
    return %c0_i32, %c0_i32_0 : i32, i32
  }
  func.func @transform_3(%arg0: i32) -> (i32, i32) {
    %c0_i32 = arith.constant 0 : i32
    %c0_i32_0 = arith.constant 0 : i32
    %c0_i32_1 = arith.constant 0 : i32
    return %c0_i32, %c0_i32_0 : i32, i32
  }
  func.func @transform_4(%arg0: i32) -> (i32, i32) {
    %c0_i32 = arith.constant 0 : i32
    %c0_i32_0 = arith.constant 0 : i32
    %c0_i32_1 = arith.constant 0 : i32
    return %c0_i32, %c0_i32_0 : i32, i32
  }
  func.func @transform_5(%arg0: i32) -> (i32, i32) {
    %c0_i32 = arith.constant 0 : i32
    %c0_i32_0 = arith.constant 0 : i32
    return %arg0, %c0_i32 : i32, i32
  }
}

</mosaic_0001>

<bundles_post_ra>
// kernel: decoder_apply_packed.1
= control target key start
LH: loop header
LB: loop body
LE: loop exit
PB: predicated region body
PF: predicated region fallthrough
CT: control target
= control target key end

     0   :  { %s1048_s18 = smov 0   ;;  %s1475_s0 = inlined_call_operand.vmem [shape: f32[125,256], index: 0, kind: input, shape index: {}]   ;;  %s1476_s1 = inlined_call_operand.vmem [shape: f32[256,256], index: 1, kind: input, shape index: {}]   ;;  %s1477_s2 = inlined_call_operand.vmem [shape: f32[1,256], index: 2, kind: input, shape index: {}]   ;;  %s1478_s3 = inlined_call_operand.vmem [shape: f32[256,128], index: 3, kind: input, shape index: {}]   ;;  %s1479_s4 = inlined_call_operand.vmem [shape: f32[1,128], index: 4, kind: input, shape index: {}]   ;;  %s1480_s5 = inlined_call_operand.vmem [shape: f32[125,128], index: 5, kind: output, shape index: {}]  }
   0x1 LB: > { %s756_s19 = sadd.s32 4294967295, %s1016_s18   ;;  %p760_p0 = scmp.ge.s32.totalorder %s1016_s18, 1  ;;  %s1016_s18 = sphi %s1048_s18, %s15_s18  }
   0x2   : > { %p189_p1 = scmp.lt.s32.totalorder %s1016_s18, 3 }
   0x4   : > { %p190_p2 = pnand %p760_p0, %p189_p1 }
   0x5   : > { %v248_v0 = vld [vmem:[%s1476_s1 + $0x8] sm:$0xff] (!%p190_p2)  ;;  %v250_v1 = vld [vmem:[%s1476_s1 + $0x18] sm:$0xff] (!%p190_p2)  ;;  %v247_v2 = vld [vmem:[%s1476_s1] sm:$0xff] (!%p190_p2)  ;;  %s761_s15 = sshll.u32 (!%p190_p2), %s756_s19, 3 }
   0x6   : > { %193 = sbr.rel (%p190_p2) target bundleno = 564 (0x234), region = 40  ;;  %v842_v3 = vpack.c.bf16 (!%p190_p2), %v250_v1, %v248_v0  ;;  %v249_v4 = vld [vmem:[%s1476_s1 + $0x10] sm:$0xff] (!%p190_p2)  ;;  %v252_v5 = vld [vmem:[%s1476_s1 + $0x28] sm:$0xff] (!%p190_p2)  ;;  %v254_v6 = vld [vmem:[%s1476_s1 + $0x38] sm:$0xff] (!%p190_p2)  ;;  %p219_p3 = scmp.lt.s32.totalorder (!%p190_p2), %s761_s15, 15 }
   0x7   : > { %v844_v7 = vpack.c.bf16 (!%p190_p2), %v249_v4, %v247_v2  ;;  %v846_v8 = vpack.c.bf16 (!%p190_p2), %v254_v6, %v252_v5  ;;  %v251_v9 = vld [vmem:[%s1476_s1 + $0x20] sm:$0xff] (!%p190_p2)  ;;  %v253_v10 = vld [vmem:[%s1476_s1 + $0x30] sm:$0xff] (!%p190_p2)  ;;  %v256_v11 = vld [vmem:[%s1476_s1 + $0x48] sm:$0xff] (!%p190_p2) }
   0x8   : > { %843 = vmatprep.subr.bf16.mxu0 (!%p190_p2), %v842_v3  ;;  %v258_v12 = vld [vmem:[%s1476_s1 + $0x58] sm:$0xff] (!%p190_p2)  ;;  %v848_v13 = vpack.c.bf16 (!%p190_p2), %v253_v10, %v251_v9  ;;  %v255_v15 = vld [vmem:[%s1476_s1 + $0x40] sm:$0xff] (!%p190_p2)  ;;  %v257_v16 = vld [vmem:[%s1476_s1 + $0x50] sm:$0xff] (!%p190_p2) }
   0x9   : > { %845 = vmatpush1.bf16.msra.mxu0 (!%p190_p2), %v844_v7  ;;  %v850_v14 = vpack.c.bf16 (!%p190_p2), %v258_v12, %v256_v11  ;;  %v260_v17 = vld [vmem:[%s1476_s1 + $0x68] sm:$0xff] (!%p190_p2)  ;;  %v262_v18 = vld [vmem:[%s1476_s1 + $0x78] sm:$0xff] (!%p190_p2)  ;;  %v852_v19 = vpack.c.bf16 (!%p190_p2), %v257_v16, %v255_v15  ;;  %v259_v21 = vld [vmem:[%s1476_s1 + $0x60] sm:$0xff] (!%p190_p2) }
   0xa   : > { %847 = vmatprep.subr.bf16.mxu0 (!%p190_p2), %v846_v8  ;;  %v854_v20 = vpack.c.bf16 (!%p190_p2), %v262_v18, %v260_v17  ;;  %v261_v22 = vld [vmem:[%s1476_s1 + $0x70] sm:$0xff] (!%p190_p2)  ;;  %v264_v23 = vld [vmem:[%s1476_s1 + $0x88] sm:$0xff] (!%p190_p2)  ;;  %v266_v24 = vld [vmem:[%s1476_s1 + $0x98] sm:$0xff] (!%p190_p2) }
   0xb   : > { %v856_v25 = vpack.c.bf16 (!%p190_p2), %v261_v22, %v259_v21  ;;  %v858_v26 = vpack.c.bf16 (!%p190_p2), %v266_v24, %v264_v23  ;;  %v263_v27 = vld [vmem:[%s1476_s1 + $0x80] sm:$0xff] (!%p190_p2)  ;;  %v265_v28 = vld [vmem:[%s1476_s1 + $0x90] sm:$0xff] (!%p190_p2)  ;;  %v268_v29 = vld [vmem:[%s1476_s1 + $0xa8] sm:$0xff] (!%p190_p2) }
   0xc   : > { %v270_v30 = vld [vmem:[%s1476_s1 + $0xb8] sm:$0xff] (!%p190_p2)  ;;  %v860_v31 = vpack.c.bf16 (!%p190_p2), %v265_v28, %v263_v27  ;;  %v267_v33 = vld [vmem:[%s1476_s1 + $0xa0] sm:$0xff] (!%p190_p2)  ;;  %v269_v34 = vld [vmem:[%s1476_s1 + $0xb0] sm:$0xff] (!%p190_p2) }
   0xd   : > { %849 = vmatpush1.bf16.msra.mxu0 %v848_v13  ;;  %s1482_s15 = smov (!%p219_p3, %s761_s15), 15  ;;  %v862_v32 = vpack.c.bf16 %v270_v30, %v268_v29  ;;  %v272_v35 = vld [vmem:[%s1476_s1 + $0xc8] sm:$0xff]  ;;  %v274_v36 = vld [vmem:[%s1476_s1 + $0xd8] sm:$0xff]  ;;  %v864_v37 = vpack.c.bf16 %v269_v34, %v267_v33  ;;  %v271_v39 = vld [vmem:[%s1476_s1 + $0xc0] sm:$0xff] }
   0xe   : > { %851 = vmatprep.subr.bf16.mxu0 %v850_v14  ;;  %s785_s17 = sshll.u32 %s1482_s15, 4  ;;  %v866_v38 = vpack.c.bf16 %v274_v36, %v272_v35  ;;  %v273_v40 = vld [vmem:[%s1476_s1 + $0xd0] sm:$0xff]  ;;  %v276_v42 = vld [vmem:[%s1476_s1 + $0xe8] sm:$0xff]  ;;  %v278_v43 = vld [vmem:[%s1476_s1 + $0xf8] sm:$0xff]  ;;  %s765_s12 = sshll.u32 %s1482_s15, 3 }
   0xf   : > { %s1140_s29 = scalar_lea.vmem %s1475_s0, %s785_s17  ;;  %v868_v44 = vpack.c.bf16 %v273_v40, %v271_v39  ;;  %v870_v45 = vpack.c.bf16 %v278_v43, %v276_v42  ;;  %v275_v46 = vld [vmem:[%s1476_s1 + $0xe0] sm:$0xff]  ;;  %v277_v47 = vld [vmem:[%s1476_s1 + $0xf0] sm:$0xff]  ;;  %v280_v48 = vld [vmem:[%s1476_s1 + $0x108] sm:$0xff]  ;;  %s1462_s20 = scalar_lea.vmem %s1480_s5, %s765_s12 }
  0x10   : > { %v232_v41 = vld [vmem:[%s1140_s29 + $0x8] sm:$0xff]  ;;  %v282_v49 = vld [vmem:[%s1476_s1 + $0x118] sm:$0xff]  ;;  %v872_v50 = vpack.c.bf16 %v277_v47, %v275_v46  ;;  %v279_v52 = vld [vmem:[%s1476_s1 + $0x100] sm:$0xff] }
  0x11   : > { %853 = vmatpush1.bf16.msra.mxu0 %v852_v19  ;;  %387 = vmatprep.mubr.f32.mxu0 %v232_v41  ;;  %v874_v51 = vpack.c.bf16 %v282_v49, %v280_v48  ;;  %v281_v53 = vld [vmem:[%s1476_s1 + $0x110] sm:$0xff]  ;;  %v284_v54 = vld [vmem:[%s1476_s1 + $0x128] sm:$0xff]  ;;  %v286_v55 = vld [vmem:[%s1476_s1 + $0x138] sm:$0xff] }
  0x12   : > { %855 = vmatprep.subr.bf16.mxu0 %v854_v20  ;;  %v876_v56 = vpack.c.bf16 %v281_v53, %v279_v52  ;;  %v878_v57 = vpack.c.bf16 %v286_v55, %v284_v54  ;;  %v283_v58 = vld [vmem:[%s1476_s1 + $0x120] sm:$0xff]  ;;  %v285_v59 = vld [vmem:[%s1476_s1 + $0x130] sm:$0xff]  ;;  %v288_v60 = vld [vmem:[%s1476_s1 + $0x148] sm:$0xff] }
  0x13   : > { %v290_v61 = vld [vmem:[%s1476_s1 + $0x158] sm:$0xff]  ;;  %v880_v62 = vpack.c.bf16 %v285_v59, %v283_v58  ;;  %v287_v0 = vld [vmem:[%s1476_s1 + $0x140] sm:$0xff]  ;;  %v289_v1 = vld [vmem:[%s1476_s1 + $0x150] sm:$0xff] }
  0x14   : > { %v882_v63 = vpack.c.bf16 %v290_v61, %v288_v60  ;;  %v292_v2 = vld [vmem:[%s1476_s1 + $0x168] sm:$0xff]  ;;  %v294_v3 = vld [vmem:[%s1476_s1 + $0x178] sm:$0xff]  ;;  %v884_v4 = vpack.c.bf16 %v289_v1, %v287_v0  ;;  %v291_v6 = vld [vmem:[%s1476_s1 + $0x160] sm:$0xff] }
  0x15   : > { %857 = vmatpush1.bf16.msra.mxu0 %v856_v25  ;;  %v886_v5 = vpack.c.bf16 %v294_v3, %v292_v2  ;;  %v293_v7 = vld [vmem:[%s1476_s1 + $0x170] sm:$0xff]  ;;  %v296_v8 = vld [vmem:[%s1476_s1 + $0x188] sm:$0xff]  ;;  %v298_v9 = vld [vmem:[%s1476_s1 + $0x198] sm:$0xff] }
  0x16   : > { %859 = vmatprep.subr.bf16.mxu0 %v858_v26  ;;  %v888_v10 = vpack.c.bf16 %v293_v7, %v291_v6  ;;  %v890_v11 = vpack.c.bf16 %v298_v9, %v296_v8  ;;  %v295_v12 = vld [vmem:[%s1476_s1 + $0x180] sm:$0xff]  ;;  %v297_v13 = vld [vmem:[%s1476_s1 + $0x190] sm:$0xff]  ;;  %v300_v14 = vld [vmem:[%s1476_s1 + $0x1a8] sm:$0xff] }
  0x17   : > { %v302_v15 = vld [vmem:[%s1476_s1 + $0x1b8] sm:$0xff]  ;;  %v892_v16 = vpack.c.bf16 %v297_v13, %v295_v12  ;;  %v299_v18 = vld [vmem:[%s1476_s1 + $0x1a0] sm:$0xff]  ;;  %v301_v19 = vld [vmem:[%s1476_s1 + $0x1b0] sm:$0xff] }
  0x18   : > { %v894_v17 = vpack.c.bf16 %v302_v15, %v300_v14  ;;  %v304_v20 = vld [vmem:[%s1476_s1 + $0x1c8] sm:$0xff]  ;;  %v306_v21 = vld [vmem:[%s1476_s1 + $0x1d8] sm:$0xff]  ;;  %v896_v22 = vpack.c.bf16 %v301_v19, %v299_v18  ;;  %v303_v24 = vld [vmem:[%s1476_s1 + $0x1c0] sm:$0xff] }
  0x19   : > { %861 = vmatpush1.bf16.msra.mxu0 %v860_v31  ;;  %v898_v23 = vpack.c.bf16 %v306_v21, %v304_v20  ;;  %v305_v25 = vld [vmem:[%s1476_s1 + $0x1d0] sm:$0xff]  ;;  %v308_v26 = vld [vmem:[%s1476_s1 + $0x1e8] sm:$0xff]  ;;  %v310_v27 = vld [vmem:[%s1476_s1 + $0x1f8] sm:$0xff] }
  0x1a   : > { %863 = vmatprep.subr.bf16.mxu0 %v862_v32  ;;  %v900_v28 = vpack.c.bf16 %v305_v25, %v303_v24  ;;  %v902_v29 = vpack.c.bf16 %v310_v27, %v308_v26  ;;  %v307_v30 = vld [vmem:[%s1476_s1 + $0x1e0] sm:$0xff]  ;;  %v309_v31 = vld [vmem:[%s1476_s1 + $0x1f0] sm:$0xff]  ;;  %v234_v34 = vld [vmem:[%s1140_s29 + $0x18] sm:$0xff] }
  0x1b   : > { %v904_v32 = vpack.c.bf16 %v309_v31, %v307_v30  ;;  %v231_v33 = vld [vmem:[%s1140_s29] sm:$0xff]  ;;  %v233_v35 = vld [vmem:[%s1140_s29 + $0x10] sm:$0xff]  ;;  %v236_v36 = vld [vmem:[%s1140_s29 + $0x28] sm:$0xff] }
  0x1c   : > { %v237_v39 = vld [vmem:[%s1140_s29 + $0x30] sm:$0xff]  ;;  %v240_v40 = vld [vmem:[%s1140_s29 + $0x48] sm:$0xff]  ;;  %v239_v41 = vld [vmem:[%s1140_s29 + $0x40] sm:$0xff] }
  0x1d   : > { %865 = vmatpush1.bf16.msra.mxu0 %v864_v37  ;;  %v235_v37 = vld [vmem:[%s1140_s29 + $0x20] sm:$0xff]  ;;  %v242_v42 = vld [vmem:[%s1140_s29 + $0x58] sm:$0xff]  ;;  %v241_v43 = vld [vmem:[%s1140_s29 + $0x50] sm:$0xff] }
  0x1e   : > { %867 = vmatprep.subr.bf16.mxu0 %v866_v38  ;;  %v238_v38 = vld [vmem:[%s1140_s29 + $0x38] sm:$0xff]  ;;  %v245_v47 = vld [vmem:[%s1140_s29 + $0x70] sm:$0xff]  ;;  %v564_v48 = vld [vmem:[%s1478_s3 + $0x80] sm:$0xff] }
  0x1f   : > { %v246_v46 = vld [vmem:[%s1140_s29 + $0x78] sm:$0xff]  ;;  %v565_v49 = vld [vmem:[%s1478_s3 + $0x88] sm:$0xff]  ;;  %v566_v54 = vld [vmem:[%s1478_s3 + $0x90] sm:$0xff] }
  0x20   : > { %v549_v52 = vld [vmem:[%s1478_s3 + $0x8] sm:$0xff]  ;;  %v567_v55 = vld [vmem:[%s1478_s3 + $0x98] sm:$0xff]  ;;  %v568_v60 = vld [vmem:[%s1478_s3 + $0xa0] sm:$0xff] }
  0x21   : > { %869 = vmatpush1.bf16.msra.mxu0 %v868_v44  ;;  %v244_v44 = vld [vmem:[%s1140_s29 + $0x68] sm:$0xff]  ;;  %v551_v58 = vld [vmem:[%s1478_s3 + $0x18] sm:$0xff]  ;;  %v570_v2 = vld [vmem:[%s1478_s3 + $0xb0] sm:$0xff] }
  0x22   : > { %871 = vmatprep.subr.bf16.mxu0 %v870_v45  ;;  %v243_v45 = vld [vmem:[%s1140_s29 + $0x60] sm:$0xff]  ;;  %v569_v61 = vld [vmem:[%s1478_s3 + $0xa8] sm:$0xff]  ;;  %v571_v3 = vld [vmem:[%s1478_s3 + $0xb8] sm:$0xff] }
  0x23   : > { %v553_v0 = vld [vmem:[%s1478_s3 + $0x28] sm:$0xff]  ;;  %v555_v6 = vld [vmem:[%s1478_s3 + $0x38] sm:$0xff]  ;;  %v572_v8 = vld [vmem:[%s1478_s3 + $0xc0] sm:$0xff] }
  0x24   : > { %v573_v9 = vld [vmem:[%s1478_s3 + $0xc8] sm:$0xff]  ;;  %v574_v14 = vld [vmem:[%s1478_s3 + $0xd0] sm:$0xff]  ;;  %v575_v15 = vld [vmem:[%s1478_s3 + $0xd8] sm:$0xff] }
  0x25   : > { %873 = vmatpush1.bf16.msra.mxu0 %v872_v50  ;;  %v906_v50 = vpack.c.bf16 %v565_v49, %v564_v48  ;;  %v557_v12 = vld [vmem:[%s1478_s3 + $0x48] sm:$0xff]  ;;  %v559_v18 = vld [vmem:[%s1478_s3 + $0x58] sm:$0xff]  ;;  %v576_v20 = vld [vmem:[%s1478_s3 + $0xe0] sm:$0xff] }
  0x26   : > { %875 = vmatprep.subr.bf16.mxu0 %v874_v51  ;;  %v548_v51 = vld [vmem:[%s1478_s3] sm:$0xff]  ;;  %v577_v21 = vld [vmem:[%s1478_s3 + $0xe8] sm:$0xff]  ;;  %v578_v26 = vld [vmem:[%s1478_s3 + $0xf0] sm:$0xff] }
  0x27   : > { %v908_v53 = vpack.c.bf16 %v549_v52, %v548_v51  ;;  %907 = vmatprep.subr.bf16.mxu1 %v906_v50  ;;  %v561_v24 = vld [vmem:[%s1478_s3 + $0x68] sm:$0xff]  ;;  %v579_v27 = vld [vmem:[%s1478_s3 + $0xf8] sm:$0xff] }
  0x28   : > { %v563_v30 = vld [vmem:[%s1478_s3 + $0x78] sm:$0xff] }
  0x29   : > { %877 = vmatpush1.bf16.msra.mxu0 %v876_v56  ;;  %909 = vmatpush3.bf16.msra.mxu1 %v908_v53  ;;  %v910_v56 = vpack.c.bf16 %v567_v55, %v566_v54 }
  0x2a   : > { %879 = vmatprep.subr.bf16.mxu0 %v878_v57  ;;  %v550_v57 = vld [vmem:[%s1478_s3 + $0x10] sm:$0xff] }
  0x2b   : > { %v912_v59 = vpack.c.bf16 %v551_v58, %v550_v57  ;;  %911 = vmatprep.subr.bf16.mxu1 %v910_v56 }
  0x2d   : > { %881 = vmatpush1.bf16.msra.mxu0 %v880_v62  ;;  %913 = vmatpush3.bf16.msra.mxu1 %v912_v59  ;;  %v914_v62 = vpack.c.bf16 %v569_v61, %v568_v60 }
  0x2e   : > { %883 = vmatprep.subr.bf16.mxu0 %v882_v63  ;;  %v552_v63 = vld [vmem:[%s1478_s3 + $0x20] sm:$0xff] }
  0x2f   : > { %v916_v1 = vpack.c.bf16 %v553_v0, %v552_v63  ;;  %915 = vmatprep.subr.bf16.mxu1 %v914_v62 }
  0x31   : > { %885 = vmatpush1.bf16.msra.mxu0 %v884_v4  ;;  %917 = vmatpush3.bf16.msra.mxu1 %v916_v1  ;;  %v918_v4 = vpack.c.bf16 %v571_v3, %v570_v2 }
  0x32   : > { %887 = vmatprep.subr.bf16.mxu0 %v886_v5  ;;  %v554_v5 = vld [vmem:[%s1478_s3 + $0x30] sm:$0xff] }
  0x33   : > { %v920_v7 = vpack.c.bf16 %v555_v6, %v554_v5  ;;  %919 = vmatprep.subr.bf16.mxu1 %v918_v4 }
  0x35   : > { %889 = vmatpush1.bf16.msra.mxu0 %v888_v10  ;;  %921 = vmatpush3.bf16.msra.mxu1 %v920_v7  ;;  %v922_v10 = vpack.c.bf16 %v573_v9, %v572_v8 }
  0x36   : > { %891 = vmatprep.subr.bf16.mxu0 %v890_v11  ;;  %v556_v11 = vld [vmem:[%s1478_s3 + $0x40] sm:$0xff] }
  0x37   : > { %v924_v13 = vpack.c.bf16 %v557_v12, %v556_v11  ;;  %923 = vmatprep.subr.bf16.mxu1 %v922_v10 }
  0x39   : > { %893 = vmatpush1.bf16.msra.mxu0 %v892_v16  ;;  %925 = vmatpush3.bf16.msra.mxu1 %v924_v13  ;;  %v926_v16 = vpack.c.bf16 %v575_v15, %v574_v14 }
  0x3a   : > { %895 = vmatprep.subr.bf16.mxu0 %v894_v17  ;;  %v558_v17 = vld [vmem:[%s1478_s3 + $0x50] sm:$0xff] }
  0x3b   : > { %v928_v19 = vpack.c.bf16 %v559_v18, %v558_v17  ;;  %927 = vmatprep.subr.bf16.mxu1 %v926_v16 }
  0x3d   : > { %897 = vmatpush1.bf16.msra.mxu0 %v896_v22  ;;  %929 = vmatpush3.bf16.msra.mxu1 %v928_v19  ;;  %v930_v22 = vpack.c.bf16 %v577_v21, %v576_v20 }
  0x3e   : > { %899 = vmatprep.subr.bf16.mxu0 %v898_v23  ;;  %v560_v23 = vld [vmem:[%s1478_s3 + $0x60] sm:$0xff] }
  0x3f   : > { %v932_v25 = vpack.c.bf16 %v561_v24, %v560_v23  ;;  %931 = vmatprep.subr.bf16.mxu1 %v930_v22 }
  0x41   : > { %901 = vmatpush1.bf16.msra.mxu0 %v900_v28  ;;  %933 = vmatpush3.bf16.msra.mxu1 %v932_v25  ;;  %v934_v28 = vpack.c.bf16 %v579_v27, %v578_v26 }
  0x42   : > { %903 = vmatprep.subr.bf16.mxu0 %v902_v29  ;;  %v562_v29 = vld [vmem:[%s1478_s3 + $0x70] sm:$0xff] }
  0x43   : > { %v936_v31 = vpack.c.bf16 %v563_v30, %v562_v29  ;;  %935 = vmatprep.subr.bf16.mxu1 %v934_v28 }
  0x45   : > { %905 = vmatpush1.bf16.msra.mxu0 %v904_v32  ;;  %937 = vmatpush3.bf16.msra.mxu1 %v936_v31  ;;  %v313_v32 = vlaneseq }
  0x48   : > { %388 = vmatmul.mubr.f32.vlgmr.msra.gmra.mrb[0].mxu0 %v231_v33  ;;  %v314_v33 = vshrl.u32 %v313_v32, 7 }
  0x49   : > { %393 = vmatprep.mubr.f32.mxu0 %v234_v34 }
  0x4a   : > { %v315_v34 = vsub.s32 0, %v314_v33 }
  0x4c   : > { %394 = vmatmul.mubr.f32.gmra.mrb[2].mxu0 %v233_v35  ;;  %v311_v35 = vld [vmem:[%s1477_s2] sm:$0x3] }
  0x4d   : > { %399 = vmatprep.mubr.f32.mxu0 %v236_v36  ;;  %v319_v36 = vsub.s32 1, %v314_v33 }
  0x50   : > { %400 = vmatmul.mubr.f32.gmra.mrb[4].mxu0 %v235_v37  ;;  %v1371_v37 = vrot.slane %v311_v35, %v315_v34 }
  0x51   : > { %405 = vmatprep.mubr.f32.mxu0 %v238_v38  ;;  %v1373_v38 = vrot.slane %v311_v35, %v319_v36 }
  0x54   : > { %406 = vmatmul.mubr.f32.gmra.mrb[6].mxu0 %v237_v39 }
  0x55   : > { %411 = vmatprep.mubr.f32.mxu0 %v240_v40 }
  0x58   : > { %412 = vmatmul.mubr.f32.gmra.mrb[8].mxu0 %v239_v41 }
  0x59   : > { %417 = vmatprep.mubr.f32.mxu0 %v242_v42 }
  0x5c   : > { %418 = vmatmul.mubr.f32.gmra.mrb[10].mxu0 %v241_v43 }
  0x5d   : > { %423 = vmatprep.mubr.f32.mxu0 %v244_v44 }
  0x60   : > { %424 = vmatmul.mubr.f32.gmra.mrb[12].mxu0 %v243_v45 }
  0x61   : > { %429 = vmatprep.mubr.f32.mxu0 %v246_v46 }
  0x64   : > { %430 = vmatmul.mubr.f32.gmra.mrb[14].mxu0 %v245_v47 }
 0x11b   : > { %v389_v39 = vpop.f32.mrb[0].mxu0 }
 0x11c   : > { %v1376_v40 = vadd.f32 %v389_v39, %v1371_v37  ;;  %v391_v41 = vpop.f32.mrb[1].mxu0 }
 0x11d   : > { %v1379_v42 = vadd.f32 %v391_v41, %v1373_v38 }
 0x11e   : > { %v766_v43 = vmul.f32 -1.442695, %v1376_v40 }
 0x11f   : > { %v767_v44 = vmul.f32 -1.442695, %v1379_v42  ;;  %v395_v45 = vpop.f32.mrb[2].mxu0 }
 0x120   : > { %946 = vpow2.f32 %v766_v43  ;;  %v1384_v46 = vadd.f32 %v395_v45, %v1371_v37  ;;  %v397_v47 = vpop.f32.mrb[3].mxu0 }
 0x121   : > { %948 = vpow2.f32 %v767_v44  ;;  %v1387_v48 = vadd.f32 %v397_v47, %v1373_v38 }
 0x122   : > { %v768_v49 = vmul.f32 -1.442695, %v1384_v46 }
 0x123   : > { %v769_v50 = vmul.f32 -1.442695, %v1387_v48  ;;  %v401_v51 = vpop.f32.mrb[4].mxu0 }
 0x124   : > { %950 = vpow2.f32 %v768_v49  ;;  %v1392_v52 = vadd.f32 %v401_v51, %v1371_v37  ;;  %v403_v53 = vpop.f32.mrb[5].mxu0 }
 0x125   : > { %952 = vpow2.f32 %v769_v50  ;;  %v1395_v54 = vadd.f32 %v403_v53, %v1373_v38 }
 0x126   : > { %v770_v55 = vmul.f32 -1.442695, %v1392_v52 }
 0x127   : > { %v771_v56 = vmul.f32 -1.442695, %v1395_v54  ;;  %v407_v57 = vpop.f32.mrb[6].mxu0 }
 0x128   : > { %954 = vpow2.f32 %v770_v55  ;;  %v1400_v58 = vadd.f32 %v407_v57, %v1371_v37  ;;  %v409_v59 = vpop.f32.mrb[7].mxu0 }
 0x129   : > { %956 = vpow2.f32 %v771_v56  ;;  %v1403_v60 = vadd.f32 %v409_v59, %v1373_v38 }
 0x12a   : > { %v947_v61 = vpop.eup %946  ;;  %v772_v62 = vmul.f32 -1.442695, %v1400_v58 }
 0x12b   : > { %v949_v63 = vpop.eup %948  ;;  %v484_v0 = vadd.f32 1.0, %v947_v61  ;;  %v773_v1 = vmul.f32 -1.442695, %v1403_v60  ;;  %v413_v2 = vpop.f32.mrb[8].mxu0 }
 0x12c   : > { %v485_v3 = vadd.f32 1.0, %v949_v63  ;;  %958 = vpow2.f32 %v772_v62  ;;  %v1408_v4 = vadd.f32 %v413_v2, %v1371_v37  ;;  %v415_v5 = vpop.f32.mrb[9].mxu0 }
 0x12d   : > { %960 = vrcp.f32 %v484_v0  ;;  %v1411_v6 = vadd.f32 %v415_v5, %v1373_v38 }
 0x12e   : > { %v951_v7 = vpop.eup %950  ;;  %962 = vrcp.f32 %v485_v3  ;;  %v774_v8 = vmul.f32 -1.442695, %v1408_v4 }
 0x12f   : > { %v953_v9 = vpop.eup %952  ;;  %v486_v10 = vadd.f32 1.0, %v951_v7  ;;  %964 = vpow2.f32 %v773_v1  ;;  %v775_v11 = vmul.f32 -1.442695, %v1411_v6  ;;  %v419_v12 = vpop.f32.mrb[10].mxu0 }
 0x130   : > { %v487_v13 = vadd.f32 1.0, %v953_v9  ;;  %966 = vpow2.f32 %v774_v8  ;;  %v1416_v14 = vadd.f32 %v419_v12, %v1371_v37  ;;  %v421_v15 = vpop.f32.mrb[11].mxu0 }
 0x131   : > { %968 = vrcp.f32 %v486_v10  ;;  %v1419_v16 = vadd.f32 %v421_v15, %v1373_v38 }
 0x132   : > { %v955_v17 = vpop.eup %954  ;;  %970 = vrcp.f32 %v487_v13  ;;  %v776_v18 = vmul.f32 -1.442695, %v1416_v14 }
 0x133   : > { %v957_v19 = vpop.eup %956  ;;  %v488_v20 = vadd.f32 1.0, %v955_v17  ;;  %972 = vpow2.f32 %v775_v11  ;;  %v777_v21 = vmul.f32 -1.442695, %v1419_v16  ;;  %v425_v22 = vpop.f32.mrb[12].mxu0 }
 0x134   : > { %v489_v23 = vadd.f32 1.0, %v957_v19  ;;  %974 = vpow2.f32 %v776_v18  ;;  %v1424_v24 = vadd.f32 %v425_v22, %v1371_v37  ;;  %v427_v25 = vpop.f32.mrb[13].mxu0 }
 0x135   : > { %976 = vrcp.f32 %v488_v20  ;;  %v1427_v26 = vadd.f32 %v427_v25, %v1373_v38 }
 0x136   : > { %v959_v27 = vpop.eup %958  ;;  %978 = vrcp.f32 %v489_v23  ;;  %v778_v28 = vmul.f32 -1.442695, %v1424_v24 }
 0x137   : > { %v961_v29 = vpop.eup %960  ;;  %v490_v30 = vadd.f32 1.0, %v959_v27  ;;  %980 = vpow2.f32 %v777_v21  ;;  %v779_v31 = vmul.f32 -1.442695, %v1427_v26  ;;  %v431_v32 = vpop.f32.mrb[14].mxu0 }
 0x138   : > { %v963_v33 = vpop.eup %962  ;;  %982 = vpow2.f32 %v778_v28  ;;  %v1432_v34 = vadd.f32 %v431_v32, %v1371_v37  ;;  %v433_v35 = vpop.f32.mrb[15].mxu0  ;;  %v532_v44 = vmul.f32 %v961_v29, %v1376_v40 }
 0x139   : > { %v965_v36 = vpop.eup %964  ;;  %v1435_v39 = vadd.f32 %v433_v35, %v1373_v38  ;;  %v533_v41 = vmul.f32 %v963_v33, %v1379_v42  ;;  %984 = vpow2.f32 %v779_v31 }
 0x13a   : > { %v967_v43 = vpop.eup %966  ;;  %v491_v45 = vadd.f32 1.0, %v965_v36  ;;  %v780_v47 = vmul.f32 -1.442695, %v1432_v34  ;;  %986 = vrcp.f32 %v490_v30 }
 0x13b   : > { %v969_v49 = vpop.eup %968  ;;  %v492_v50 = vadd.f32 1.0, %v967_v43  ;;  %v781_v37 = vmul.f32 -1.442695, %v1435_v39  ;;  %651 = vmatprep.mubr.f32.mxu1 %v533_v41 }
 0x13c   : > { %v971_v51 = vpop.eup %970  ;;  %988 = vrcp.f32 %v491_v45  ;;  %652 = vmatmul.mubr.f32.vlgmr.msra.gmra.mrb[0].mxu1 %v532_v44  ;;  %v534_v40 = vmul.f32 %v969_v49, %v1384_v46 }
 0x13d   : > { %v973_v38 = vpop.eup %972  ;;  %v535_v53 = vmul.f32 %v971_v51, %v1387_v48  ;;  %990 = vrcp.f32 %v492_v50 }
 0x13e   : > { %v975_v42 = vpop.eup %974  ;;  %v493_v55 = vadd.f32 1.0, %v973_v38  ;;  %992 = vpow2.f32 %v780_v47 }
 0x13f   : > { %v977_v56 = vpop.eup %976  ;;  %v494_v57 = vadd.f32 1.0, %v975_v42  ;;  %994 = vpow2.f32 %v781_v37  ;;  %656 = vmatprep.mubr.f32.mxu1 %v535_v53 }
 0x140   : > { %v979_v59 = vpop.eup %978  ;;  %996 = vrcp.f32 %v493_v55  ;;  %657 = vmatmul.mubr.f32.gmra.mrb[2].mxu1 %v534_v40  ;;  %v536_v0 = vmul.f32 %v977_v56, %v1392_v52 }
 0x141   : > { %v981_v61 = vpop.eup %980  ;;  %v537_v62 = vmul.f32 %v979_v59, %v1395_v54  ;;  %998 = vrcp.f32 %v494_v57 }
 0x142   : > { %v983_v63 = vpop.eup %982  ;;  %v495_v48 = vadd.f32 1.0, %v981_v61 }
 0x143   : > { %v496_v1 = vadd.f32 1.0, %v983_v63  ;;  %661 = vmatprep.mubr.f32.mxu1 %v537_v62  ;;  %v985_v46 = vpop.eup %984 }
 0x144   : > { %1000 = vrcp.f32 %v495_v48  ;;  %662 = vmatmul.mubr.f32.gmra.mrb[4].mxu1 %v536_v0  ;;  %v987_v2 = vpop.eup %986  ;;  %v497_v3 = vadd.f32 1.0, %v985_v46 }
 0x145   : > { %1002 = vrcp.f32 %v496_v1  ;;  %v538_v54 = vmul.f32 %v987_v2, %v1400_v58 }
 0x146   : > { %v989_v5 = vpop.eup %988  ;;  %1004 = vrcp.f32 %v497_v3 }
 0x147   : > { %v991_v7 = vpop.eup %990  ;;  %v539_v8 = vmul.f32 %v989_v5, %v1403_v60 }
 0x148   : > { %v993_v9 = vpop.eup %992  ;;  %v540_v15 = vmul.f32 %v991_v7, %v1408_v4 }
 0x149   : > { %v995_v10 = vpop.eup %994  ;;  %v498_v52 = vadd.f32 1.0, %v993_v9  ;;  %666 = vmatprep.mubr.f32.mxu1 %v539_v8 }
 0x14a   : > { %v997_v11 = vpop.eup %996  ;;  %v499_v12 = vadd.f32 1.0, %v995_v10  ;;  %667 = vmatmul.mubr.f32.gmra.mrb[6].mxu1 %v538_v54 }
 0x14b   : > { %v541_v13 = vmul.f32 %v997_v11, %v1411_v6  ;;  %1006 = vrcp.f32 %v498_v52  ;;  %v999_v17 = vpop.eup %998 }
 0x14c   : > { %1008 = vrcp.f32 %v499_v12  ;;  %v542_v58 = vmul.f32 %v999_v17, %v1416_v14  ;;  %v782_v14 = vld [vmem:[%s1479_s4] ss:$0 sm:$0xff] }
 0x14d   : > { %671 = vmatprep.mubr.f32.mxu1 %v541_v13 }
 0x14e   : > { %v1001_v18 = vpop.eup %1000  ;;  %672 = vmatmul.mubr.f32.gmra.mrb[8].mxu1 %v540_v15 }
 0x14f   : > { %v543_v60 = vmul.f32 %v1001_v18, %v1419_v16  ;;  %v1003_v19 = vpop.eup %1002 }
 0x150   : > { %v1005_v20 = vpop.eup %1004  ;;  %v544_v6 = vmul.f32 %v1003_v19, %v1424_v24 }
 0x151   : > { %676 = vmatprep.mubr.f32.mxu1 %v543_v60  ;;  %v545_v21 = vmul.f32 %v1005_v20, %v1427_v26 }
 0x152   : > { %677 = vmatmul.mubr.f32.gmra.mrb[10].mxu1 %v542_v58 }
 0x153   : > { %681 = vmatprep.mubr.f32.mxu1 %v545_v21 }
 0x155   : > { %v1007_v4 = vpop.eup %1006 }
 0x156   : > { %v1009_v22 = vpop.eup %1008  ;;  %682 = vmatmul.mubr.f32.gmra.mrb[12].mxu1 %v544_v6  ;;  %v546_v25 = vmul.f32 %v1007_v4, %v1432_v34 }
 0x157   : > { %v547_v23 = vmul.f32 %v1009_v22, %v1435_v39 }
 0x159   : > { %686 = vmatprep.mubr.f32.mxu1 %v547_v23 }
 0x15a   : > { %687 = vmatmul.mubr.f32.gmra.mrb[14].mxu1 %v546_v25 }
 0x20f   : > { %v818_v16 = vpop.f32.mrb[0].mxu1 }
 0x210   : > { %v819_v26 = vpop.f32.mrb[1].mxu1 }
 0x211   : > { %v820_v27 = vadd.f32 %v819_v26, %v818_v16 }
 0x213   : > { %v654_v24 = vadd.f32 %v820_v27, %v782_v14  ;;  %v821_v28 = vpop.f32.mrb[2].mxu1 }
 0x214   : > { %v822_v29 = vpop.f32.mrb[3].mxu1 }
 0x215   : > { %692 = vst [vmem:[%s1462_s20] sm:$0xff] %v654_v24  ;;  %v823_v30 = vadd.f32 %v822_v29, %v821_v28 }
 0x217   : > { %v659_v31 = vadd.f32 %v823_v30, %v782_v14  ;;  %v824_v32 = vpop.f32.mrb[4].mxu1 }
 0x218   : > { %v825_v33 = vpop.f32.mrb[5].mxu1 }
 0x219   : > { %693 = vst [vmem:[%s1462_s20 + $0x8] sm:$0xff] %v659_v31  ;;  %v826_v34 = vadd.f32 %v825_v33, %v824_v32 }
 0x21b   : > { %v664_v35 = vadd.f32 %v826_v34, %v782_v14 }
 0x21d   : > { %694 = vst [vmem:[%s1462_s20 + $0x10] sm:$0xff] %v664_v35  ;;  %v827_v36 = vpop.f32.mrb[6].mxu1 }
 0x21e   : > { %v828_v39 = vpop.f32.mrb[7].mxu1 }
 0x21f   : > { %v829_v41 = vadd.f32 %v828_v39, %v827_v36 }
 0x221   : > { %v669_v43 = vadd.f32 %v829_v41, %v782_v14  ;;  %v830_v44 = vpop.f32.mrb[8].mxu1 }
 0x222   : > { %v831_v45 = vpop.f32.mrb[9].mxu1 }
 0x223   : > { %695 = vst [vmem:[%s1462_s20 + $0x18] sm:$0xff] %v669_v43  ;;  %v832_v47 = vadd.f32 %v831_v45, %v830_v44 }
 0x225   : > { %v674_v49 = vadd.f32 %v832_v47, %v782_v14  ;;  %v833_v50 = vpop.f32.mrb[10].mxu1 }
 0x226   : > { %v834_v37 = vpop.f32.mrb[11].mxu1 }
 0x227   : > { %696 = vst [vmem:[%s1462_s20 + $0x20] sm:$0xff] %v674_v49  ;;  %v835_v51 = vadd.f32 %v834_v37, %v833_v50 }
 0x229   : > { %v679_v38 = vadd.f32 %v835_v51, %v782_v14  ;;  %v836_v53 = vpop.f32.mrb[12].mxu1 }
 0x22a   : > { %v837_v42 = vpop.f32.mrb[13].mxu1 }
 0x22b   : > { %697 = vst [vmem:[%s1462_s20 + $0x28] sm:$0xff] %v679_v38  ;;  %v838_v40 = vadd.f32 %v837_v42, %v836_v53 }
 0x22d   : > { %v684_v55 = vadd.f32 %v838_v40, %v782_v14  ;;  %v839_v56 = vpop.f32.mrb[14].mxu1 }
 0x22e   : > { %v840_v57 = vpop.f32.mrb[15].mxu1 }
 0x22f   : > { %698 = vst [vmem:[%s1462_s20 + $0x30] sm:$0xff] %v684_v55  ;;  %v841_v59 = vadd.f32 %v840_v57, %v839_v56 }
 0x231   : > { %v689_v61 = vadd.f32 %v841_v59, %v782_v14 }
 0x233   : > { %699 = vst [vmem:[%s1462_s20 + $0x38] sm:$0xff] %v689_v61 }
 0x234 PF: > { %s15_s18 = sadd.s32 1, %s1016_s18  }
 0x235   : > { %p12_p4 = scmp.ge.s32.totalorder %s15_s18, 4  }
 0x237   :  { %14 = sbr.rel (!%p12_p4) target bundleno = 1 (0x1), region = 70 }

</bundles_post_ra>
